<compile_context>
chip_gen: v7x
topology: tpu7x:2x2x1
jax: 0.10.0
libtpu: 0.0.40
codegen_flags: <defaults>
</compile_context>

<pallas_src>
import jax
import jax.numpy as jnp
from jax.experimental import pallas as pl
from jax.experimental.pallas import tpu as pltpu


def _se_kernel(x_ref, w1_ref, w2_ref, o_ref):
    # x_ref / o_ref : (wb, C, HW) in I/O dtype
    # w1_ref        : (C, Ch) f32, already scaled by 1/HW
    # w2_ref        : (Ch, C) f32

    # ---- squeeze: sum over the spatial (lane) axis, accumulate in f32 ----
    pooled = jnp.sum(x_ref[...].astype(jnp.float32), axis=-1)           # (wb, C)

    # ---- excitation MLP: Linear -> SiLU -> Linear -> Sigmoid (all f32) ----
    h = jnp.dot(pooled, w1_ref[...], preferred_element_type=jnp.float32)  # (wb, Ch)
    h = h * jax.nn.sigmoid(h)                                            # SiLU
    g = jax.nn.sigmoid(
        jnp.dot(h, w2_ref[...], preferred_element_type=jnp.float32))     # (wb, C)
    g = g.astype(o_ref.dtype)

    # ---- scale: re-read x from VMEM (vld is free) and gate over lanes ----
    o_ref[...] = x_ref[...] * g[:, :, None]


def squeeze_excitation(x, w1, w2, *, vmem_tile_budget_bytes=48 << 20):
    """SqueezeExcitation forward.

    x  : (B, C, H, W)  float32 or bfloat16 (streamed in this dtype)
    w1 : (C, Ch)   == transpose of the first  nn.Linear weight (Ch = int(C*rate))
    w2 : (Ch, C)   == transpose of the second nn.Linear weight
    """
    B, C, H, W = x.shape
    HW = H * W
    Ch = w1.shape[1]
    assert w1.shape == (C, Ch) and w2.shape == (Ch, C)

    dtype = x.dtype
    itemsize = jnp.dtype(dtype).itemsize
    x3 = x.reshape(B, C, HW)                      # contiguous merge -> no copy

    # Fold 1/HW into W1 (exact: no bias), keep gate weights in f32.
    w1s = (w1 * (1.0 / HW)).astype(jnp.float32)
    w2f = w2.astype(jnp.float32)

    # ---- choose wb from the VMEM budget (2 in + 2 out buffers per step) ----
    per_row_bytes = 4 * C * HW * itemsize
    wb = max(1, min(B, vmem_tile_budget_bytes // per_row_bytes))

    # Guarantee >= 2 (prefer 4) grid steps so the pipeline overlaps and the
    # "parallel" batch axis can shard across v7x's two TensorCores.
    if B >= 2:
        target_steps = min(B, 4)
        wb = min(wb, max(1, B // target_steps))

    # Prefer a wb that divides B (no ragged tail) if it costs < 2x more steps;
    # otherwise keep wb and let Pallas mask the last block (rows independent).
    if B % wb != 0:
        for d in range(wb, 0, -1):
            if B % d == 0:
                if 2 * d >= wb:
                    wb = d
                break

    n_blocks = pl.cdiv(B, wb)

    # Scoped VMEM limit: tile double-buffers + weight double-buffers + headroom,
    # clamped under v7x's 64 MiB/TC and above v5e's small default.
    weights_bytes = 2 * (C * Ch + Ch * C) * 4
    vmem_limit = 4 * wb * C * HW * itemsize + 2 * weights_bytes + (2 << 20)
    vmem_limit = int(min(max(vmem_limit, 16 << 20), 56 << 20))

    out = pl.pallas_call(
        _se_kernel,
        out_shape=jax.ShapeDtypeStruct((B, C, HW), dtype),
        grid_spec=pltpu.PrefetchScalarGridSpec(
            num_scalar_prefetch=0,
            grid=(n_blocks,),
            in_specs=[
                pl.BlockSpec((wb, C, HW), lambda i: (i, 0, 0)),  # x tile
                pl.BlockSpec((C, Ch), lambda i: (0, 0)),         # W1^T / HW (resident)
                pl.BlockSpec((Ch, C), lambda i: (0, 0)),         # W2^T     (resident)
            ],
            out_specs=pl.BlockSpec((wb, C, HW), lambda i: (i, 0, 0)),
        ),
        compiler_params=pltpu.CompilerParams(
            dimension_semantics=("parallel",),
            vmem_limit_bytes=vmem_limit),
    )(x3, w1s, w2f)

    return out.reshape(B, C, H, W)


def _reference(x, w1, w2):
    """Pure-JAX reference mirroring the PyTorch forward (f32)."""
    pooled = jnp.mean(x, axis=(2, 3))                 # (B, C)
    h = pooled @ w1
    h = h * jax.nn.sigmoid(h)                         # SiLU
    g = jax.nn.sigmoid(h @ w2)                        # (B, C)
    return x * g[:, :, None, None]


if __name__ == "__main__":
    # Small config consistent with the module: hidden = int(dim * 0.25).
    batch, dim, H, W = 2, 64, 16, 16
    shrinkage_rate = 0.25
    hidden = int(dim * shrinkage_rate)

    key = jax.random.PRNGKey(0)
    kx, k1, k2 = jax.random.split(key, 3)

    x = jax.random.normal(kx, (batch, dim, H, W), jnp.float32)
    # nn.Linear weights stored transposed: (in_features, out_features), no bias.
    w1 = jax.random.normal(k1, (dim, hidden), jnp.float32) * 0.1
    w2 = jax.random.normal(k2, (hidden, dim), jnp.float32) * 0.1

    ref = _reference(x, w1, w2)

    # f32 I/O path: bit-tight vs. the reference.
    out = jax.block_until_ready(squeeze_excitation(x, w1, w2))
    assert out.shape == ref.shape and out.dtype == ref.dtype
    err = float(jnp.max(jnp.abs(out - ref)))
    assert err < 1e-5, f"f32 mismatch vs pure-JAX reference: {err}"

    # bf16 I/O path (halves HBM traffic on v6e/v7x): looser tolerance.
    out_bf16 = jax.block_until_ready(
        squeeze_excitation(x.astype(jnp.bfloat16), w1, w2))
    assert out_bf16.dtype == jnp.bfloat16
    err_bf16 = float(jnp.max(jnp.abs(out_bf16.astype(jnp.float32) - ref)))
    assert err_bf16 < 1e-1, f"bf16 mismatch vs pure-JAX reference: {err_bf16}"

    print("KERNEL_OK")
</pallas_src>

<mosaic_0001>
module attributes {stable_mosaic.version = 11 : i64} {
  func.func @_se_kernel(%arg0: i32, %arg1: memref<1x64x256xf32, #tpu.memory_space<vmem>>, %arg2: memref<64x16xf32, #tpu.memory_space<vmem>>, %arg3: memref<16x64xf32, #tpu.memory_space<vmem>>, %arg4: memref<1x64x256xf32, #tpu.memory_space<vmem>>) attributes {dimension_semantics = [#tpu.dimension_semantics<parallel>], iteration_bounds = array<i64: 2>, scalar_prefetch = 0 : i64, scratch_operands = 0 : i64, tpu.core_type = #tpu.core_type<tc>, window_params = [{transform_indices = @transform_0, window_bounds = array<i64: 1, 64, 256>}, {pipeline_mode = #tpu.pipeline_mode<synchronous>, transform_indices = @transform_1, window_bounds = array<i64: 64, 16>}, {pipeline_mode = #tpu.pipeline_mode<synchronous>, transform_indices = @transform_2, window_bounds = array<i64: 16, 64>}, {transform_indices = @transform_3, window_bounds = array<i64: 1, 64, 256>}]} {
    %c0 = arith.constant 0 : index
    %c0_0 = arith.constant 0 : index
    %c0_1 = arith.constant 0 : index
    %0 = vector.load %arg1[%c0, %c0_0, %c0_1] : memref<1x64x256xf32, #tpu.memory_space<vmem>>, vector<1x64x256xf32>
    %cst = arith.constant dense<0.000000e+00> : vector<1x64xf32>
    %1 = vector.multi_reduction <add>, %0, %cst [2] : vector<1x64x256xf32> to vector<1x64xf32>
    %c0_2 = arith.constant 0 : index
    %c0_3 = arith.constant 0 : index
    %2 = vector.load %arg2[%c0_2, %c0_3] : memref<64x16xf32, #tpu.memory_space<vmem>>, vector<64x16xf32>
    %cst_4 = arith.constant dense<0.000000e+00> : vector<1x16xf32>
    %3 = tpu.matmul %1, %2, %cst_4 {dimension_numbers = #tpu.dot_dimension_numbers<[1], [0], [0], [1], [0, 0, 1, 1], [], []>} : vector<1x64xf32>, vector<64x16xf32>, vector<1x16xf32> -> vector<1x16xf32>
    %4 = arith.negf %3 : vector<1x16xf32>
    %5 = math.exp %4 : vector<1x16xf32>
    %cst_5 = arith.constant 1.000000e+00 : f32
    %6 = vector.broadcast %cst_5 : f32 to vector<1x16xf32>
    %7 = arith.addf %6, %5 : vector<1x16xf32>
    %8 = arith.divf %6, %7 : vector<1x16xf32>
    %9 = arith.mulf %3, %8 : vector<1x16xf32>
    %c0_6 = arith.constant 0 : index
    %c0_7 = arith.constant 0 : index
    %10 = vector.load %arg3[%c0_6, %c0_7] : memref<16x64xf32, #tpu.memory_space<vmem>>, vector<16x64xf32>
    %cst_8 = arith.constant dense<0.000000e+00> : vector<1x64xf32>
    %11 = tpu.matmul %9, %10, %cst_8 {dimension_numbers = #tpu.dot_dimension_numbers<[1], [0], [0], [1], [0, 0, 1, 1], [], []>} : vector<1x16xf32>, vector<16x64xf32>, vector<1x64xf32> -> vector<1x64xf32>
    %12 = arith.negf %11 : vector<1x64xf32>
    %13 = math.exp %12 : vector<1x64xf32>
    %cst_9 = arith.constant 1.000000e+00 : f32
    %14 = vector.broadcast %cst_9 : f32 to vector<1x64xf32>
    %15 = arith.addf %14, %13 : vector<1x64xf32>
    %16 = arith.divf %14, %15 : vector<1x64xf32>
    %c0_10 = arith.constant 0 : index
    %c0_11 = arith.constant 0 : index
    %c0_12 = arith.constant 0 : index
    %17 = vector.load %arg1[%c0_10, %c0_11, %c0_12] : memref<1x64x256xf32, #tpu.memory_space<vmem>>, vector<1x64x256xf32>
    %18 = vector.shape_cast %16 : vector<1x64xf32> to vector<1x64x1xf32>
    %19 = vector.broadcast %18 : vector<1x64x1xf32> to vector<1x64x256xf32>
    %20 = arith.mulf %17, %19 : vector<1x64x256xf32>
    %c0_13 = arith.constant 0 : index
    %c0_14 = arith.constant 0 : index
    %c0_15 = arith.constant 0 : index
    %21 = vector.load %arg4[%c0_13, %c0_14, %c0_15] : memref<1x64x256xf32, #tpu.memory_space<vmem>>, vector<1x64x256xf32>
    tpu.vector_store %arg4[%c0_13, %c0_14, %c0_15], %20 {strides = array<i32>} : memref<1x64x256xf32, #tpu.memory_space<vmem>>, vector<1x64x256xf32>,
    return
  }
  func.func @transform_0(%arg0: i32) -> (i32, i32, i32) {
    %c0_i32 = arith.constant 0 : i32
    %c0_i32_0 = arith.constant 0 : i32
    %c0_i32_1 = arith.constant 0 : i32
    return %arg0, %c0_i32, %c0_i32_0 : i32, i32, i32
  }
  func.func @transform_1(%arg0: i32) -> (i32, i32) {
    %c0_i32 = arith.constant 0 : i32
    %c0_i32_0 = arith.constant 0 : i32
    %c0_i32_1 = arith.constant 0 : i32
    return %c0_i32, %c0_i32_0 : i32, i32
  }
  func.func @transform_2(%arg0: i32) -> (i32, i32) {
    %c0_i32 = arith.constant 0 : i32
    %c0_i32_0 = arith.constant 0 : i32
    %c0_i32_1 = arith.constant 0 : i32
    return %c0_i32, %c0_i32_0 : i32, i32
  }
  func.func @transform_3(%arg0: i32) -> (i32, i32, i32) {
    %c0_i32 = arith.constant 0 : i32
    %c0_i32_0 = arith.constant 0 : i32
    %c0_i32_1 = arith.constant 0 : i32
    return %arg0, %c0_i32, %c0_i32_0 : i32, i32, i32
  }
}

</mosaic_0001>

<bundles_post_ra>
// kernel: tpu_custom_call.1
= control target key start
LH: loop header
LB: loop body
LE: loop exit
PB: predicated region body
PF: predicated region fallthrough
CT: control target
= control target key end

     0   :  { %8 = vsyncpa [#allocation3], 0  ;;  %s1167_s0 = inlined_call_operand.hbm [shape: f32[2,64,256], index: 0, kind: input, shape index: {}]   ;;  %s1168_s1 = inlined_call_operand.vmem [shape: f32[64,16], index: 1, kind: input, shape index: {}]   ;;  %s1169_s2 = inlined_call_operand.vmem [shape: f32[16,64], index: 2, kind: input, shape index: {}]   ;;  %s1170_s3 = inlined_call_operand.hbm [shape: f32[2,64,256], index: 3, kind: output, shape index: {}]  }
   0x1   :  { %10 = vsyncpa [#allocation3 + $0x1], 0 }
   0x2   :  { %11 = vsyncpa [#allocation4], 0 }
   0x3   :  { %13 = vsyncpa [#allocation4 + $0x1], 0  ;;  %s877_s12 = smov 0   ;;  %s879_s13 = smov 0  }
   0x4   :  { %s881_s14 = smov 0   ;;  %s883_s15 = smov 0  }
   0x5 LB: > { %s898_s16 = sadd.s32 4294967295, %s846_s15   ;;  %s616_s17 = sadd.s32 4294967294, %s846_s15   ;;  %s846_s15 = sphi %s883_s15, %s1183_s15   ;;  %s842_s14 = sphi %s881_s14, %s1182_s14   ;;  %s838_s13 = sphi %s879_s13, %s1181_s13   ;;  %s834_s12 = sphi %s877_s12, %s1180_s12  }
   0x6   : > { %s902_s18 = sadd.s32 1, %s846_s15   ;;  %s26_s19 = sadd.s32 1, %s842_s14 }
   0x7   : > { %s23_s20 = ssub.s32 %s846_s15, %s902_s18  ;;  %p33_p0 = scmp.ne.s32.totalorder %s842_s14, %s838_s13 }
   0x8   : > { %p24_p1 = scmp.eq.s32.totalorder %s23_s20, 0  ;;  %p34_p2 = scmp.eq.s32.totalorder %s846_s15, 0 }
   0x9   : > { %p39_p3 = scmp.ne.s32.totalorder %s838_s13, %s834_s12  ;;  %p40_p4 = scmp.eq.s32.totalorder %s898_s16, 0 }
   0xa   : > { %s914_s21 = scalar_select %p24_p1, %s842_s14, %s26_s19  }
   0xb   : > { %p916_p5 = por %p34_p2, %p33_p0  ;;  %p920_p6 = por %p40_p4, %p39_p3 }
   0xc   : > { %p105_p7 = scmp.eq.s32.totalorder %s898_s16, 1  ;;  %p111_p8 = scmp.eq.s32.totalorder %s616_s17, 1 }
   0xd   : > { %p701_p10 = scmp.lt.s32.totalorder %s846_s15, 2  ;;  %s137_s26 = sand.u32 1, %s842_s14  }
   0xe   : > { %p927_p11 = por %p105_p7, %p33_p0  ;;  %p931_p12 = por %p111_p8, %p39_p3 }
   0xf   : > { %s634_s27 = sshll.u32 %s846_s15, 11  ;;  %s619_s28 = sshll.u32 %s137_s26, 7 }
  0x10   : > { %s1174_s24 = scalar_select %p927_p11, 1, 0 }
  0x11   : > { %s1175_s25 = scalar_select %p931_p12, 1, 0 }
  0x12   : > { %s940_s4 = scalar_lea.hbm %s1167_s0, %s634_s27  ;;  %s141_s5 = scalar_lea.vmem [#allocation2], %s619_s28 }
  0x13   : > { %s148_s6 = sshll.u32 %s141_s5, 4  ;;  %p944_p13 = pnand %p701_p10, %p916_p5  ;;  %s948_s6 = int_to_ptr.vmem [resolvable:$true] %s148_s6 }
  0x14   : > { %s950_s8 = scalar_lea.sflag [#allocation3], %s137_s26  ;;  %s750_s9 = scalar_lea.hbm %s940_s4, 2048 }
  0x15   : > { %p751_p0 = scmp.ne.s32.totalorder %s940_s4, %s750_s9  ;;  %p752_p1 = pneg %p944_p13 }
  0x16   : > { %s755_s17 = scalar_lea.hbm %s1167_s0, 4096  ;;  %p756_p4 = scmp.lt.u32.totalorder %s940_s4, %s1167_s0 }
  0x17   : > { %p753_p2 = pnand %p752_p1, %p751_p0  ;;  %p757_p5 = scmp.lt.u32.totalorder %s755_s17, %s750_s9 }
  0x18   : > { %p759_p8 = scmp.lt.u32.totalorder %s750_s9, %s940_s4 }
  0x19   : > { %p754_p3 = pneg %p753_p2  ;;  %p758_p7 = por %p757_p5, %p756_p4 }
  0x1b   : > { %p760_p10 = por %p759_p8, %p758_p7 }
  0x1d   : > { %p761_p9 = pnand %p760_p10, %p754_p3 }
  0x1f   : > { %764 = shalt.err (!%p761_p9)
}
  0x20   : > { %s765_s22 = scalar_lea.vmem %s948_s6, 2048  ;;  %s848_s26 = smov [#allocation2]  }
  0x21   : > { %p766_p0 = scmp.ne.s32.totalorder %s948_s6, %s765_s22  ;;  %s770_s27 = sshll.u32 %s848_s26, 4  ;;  %s771_s27 = int_to_ptr.vmem [resolvable:$false] %s770_s27 }
  0x22   : > { %s772_s28 = scalar_lea.vmem %s771_s27, 4096  ;;  %p773_p11 = scmp.lt.s32.totalorder %s948_s6, %s771_s27 }
  0x23   : > { %p768_p2 = pnand %p766_p0, %p752_p1  ;;  %p774_p4 = scmp.lt.s32.totalorder %s772_s28, %s765_s22 }
  0x25   : > { %p769_p12 = pneg %p768_p2  ;;  %p775_p5 = por %p774_p4, %p773_p11 }
  0x27   : > { %p776_p7 = pnand %p775_p5, %p769_p12 }
  0x29   : > { %779 = shalt.err (!%p776_p7)
}
  0x2a   : > { %s849_s29 = smov 256   ;;  %s850_s30 = smov 16  }
  0x2b   : > { %696 = dma.hbm_to_vmem [thread:$0]  (!%p944_p13), %s940_s4, 2048, %s948_s6, %s950_s8, %s849_s29, %s849_s29, %s850_s30  }
  0x2c   : > { %p622_p9 = scmp.ge.s32.totalorder %s846_s15, 1  ;;  %p156_p1 = scmp.lt.s32.totalorder %s846_s15, 3 }
  0x2e   : > { %p157_p3 = pnand %p622_p9, %p156_p1 }
  0x2f   : > { %s981_s5 = sand.u32 (!%p157_p3), 1, %s838_s13  }
  0x30   : > { %160 = sbr.rel (%p157_p3) target bundleno = 845 (0x34d), region = 32  ;;  %s623_s9 = sshll.u32 (!%p157_p3), %s981_s5, 7 }
  0x31   : > { %s163_s10 = scalar_lea.sflag (!%p157_p3), [#allocation3], %s981_s5  ;;  %s166_s11 = scalar_lea.vmem (!%p157_p3), [#allocation2], %s623_s9 }
  0x37   : > { %825 = dma.done.wait (%p920_p6), %s163_s10, 2048  }
  0x38   : > { %827 = vsyncadd (%p920_p6), %s163_s10, 4294965248  ;;  %v991_v0 = vld [vmem:[%s166_s11] sm:$0xff]  ;;  %v993_v1 = vld [vmem:[%s166_s11 + $0x8] sm:$0xff]  ;;  %v851_v27 = vmov 0.0|0.0   ;;  %vm852_vm0 = vmmov 0   ;;  %v853_v37 = vmov 0.0   ;;  %v245_v38 = vlaneseq }
  0x39   : > { %v995_v2 = vld [vmem:[%s166_s11 + $0x20] sm:$0xff]  ;;  %v205_v3 = vadd.f32 %v993_v1, %v991_v0  ;;  %v999_v4 = vld [vmem:[%s166_s11 + $0x28] sm:$0xff]  ;;  %v1001_v5 = vld [vmem:[%s166_s11 + $0x10] sm:$0xff]  ;;  %674 = vmatprep.subr.bf16.mxu0 %v851_v27  ;;  %686 = vmatprep.subr.bf16.mxu1 %v851_v27  ;;  %vm256_vm1 = vcmask 130112   ;;  %vm263_vm2 = vcmask 195712   ;;  %vm270_vm3 = vcmask 261312  }
  0x3a   : > { %v1003_v6 = vld [vmem:[%s166_s11 + $0x18] sm:$0xff]  ;;  %v211_v7 = vadd.f32 %v999_v4, %v995_v2  ;;  %v1007_v8 = vld [vmem:[%s166_s11 + $0x30] sm:$0xff]  ;;  %v1015_v12 = vld [vmem:[%s166_s11 + $0x40] sm:$0xff]  ;;  %664 = vmatprep.mubr.msk.f32.mxu0 %vm852_vm0, %v853_v37  ;;  %671 = vmatprep.mubr.msk.f32.mxu1 %vm852_vm0, %v853_v37  ;;  %v246_v39 = vand.u32 127, %v245_v38  ;;  %v1063_v40 = vshrl.u32 %v245_v38, 7  ;;  %vm277_vm4 = vcmask 326912  }
  0x3b   : > { %v1009_v9 = vld [vmem:[%s166_s11 + $0x38] sm:$0xff]  ;;  %206 = vadd.xlane.f32.xlu0 %v205_v3  ;;  %v208_v10 = vadd.f32 %v1003_v6, %v1001_v5  ;;  %v1017_v13 = vld [vmem:[%s166_s11 + $0x48] sm:$0xff]  ;;  %v1019_v14 = vld [vmem:[%s166_s11 + $0x50] sm:$0xff]  ;;  %vm284_vm5 = vcmask 392512   ;;  %vm291_vm6 = vcmask 458112   ;;  %vm298_vm7 = vcmask 523712  }
  0x3c   : > { %212 = vadd.xlane.f32.xlu1 %v211_v7  ;;  %v214_v11 = vadd.f32 %v1009_v9, %v1007_v8  ;;  %v1021_v15 = vld [vmem:[%s166_s11 + $0x58] sm:$0xff]  ;;  %v217_v16 = vadd.f32 %v1017_v13, %v1015_v12  ;;  %v1027_v18 = vld [vmem:[%s166_s11 + $0x60] sm:$0xff]  ;;  %v1029_v19 = vld [vmem:[%s166_s11 + $0x68] sm:$0xff]  ;;  %v251_v41 = vadd.s32 4294967288, %v246_v39  ;;  %v258_v42 = vadd.s32 4294967280, %v246_v39  ;;  %s1086_s8 = scalar_lea.vmem [#allocation5], %s623_s9 }
  0x3d   : > { %v220_v17 = vadd.f32 %v1021_v15, %v1019_v14  ;;  %v1031_v20 = vld [vmem:[%s166_s11 + $0x70] sm:$0xff]  ;;  %v1033_v21 = vld [vmem:[%s166_s11 + $0x78] sm:$0xff]  ;;  %v223_v22 = vadd.f32 %v1029_v19, %v1027_v18  ;;  %v229_v24 = vld [vmem:[%s1168_s1] sm:$0xff]  ;;  %v265_v43 = vadd.s32 4294967272, %v246_v39  ;;  %v249_v45 = vsub.s32 %v246_v39, %v1063_v40  ;;  %s635_s9 = sshll.u32 %s898_s16, 11  ;;  %s543_s17 = sshll.u32 %s1086_s8, 4  ;;  %s1119_s17 = int_to_ptr.vmem [resolvable:$true] %s543_s17 }
  0x3e   : > { %v226_v23 = vadd.f32 %v1033_v21, %v1031_v20  ;;  %v230_v25 = vld [vmem:[%s1168_s1 + $0x8] sm:$0xff]  ;;  %v231_v28 = vld [vmem:[%s1168_s1 + $0x10] sm:$0xff]  ;;  %v232_v29 = vld [vmem:[%s1168_s1 + $0x18] sm:$0xff]  ;;  %v254_v47 = vsub.s32 %v251_v41, %v1063_v40  ;;  %v272_v48 = vadd.s32 4294967264, %v246_v39  ;;  %v261_v49 = vsub.s32 %v258_v42, %v1063_v40  ;;  %s1117_s22 = scalar_lea.hbm %s1170_s3, %s635_s9  ;;  %s530_s16 = scalar_lea.sflag [#allocation4], %s981_s5 }
  0x3f   : > { %209 = vadd.xlane.f32.xlu0 %v208_v10  ;;  %v675_v26 = vpack.c.bf16 %v230_v25, %v229_v24  ;;  %v678_v30 = vpack.c.bf16 %v232_v29, %v231_v28  ;;  %v233_v31 = vld [vmem:[%s1168_s1 + $0x20] sm:$0xff]  ;;  %v234_v32 = vld [vmem:[%s1168_s1 + $0x28] sm:$0xff]  ;;  %v235_v34 = vld [vmem:[%s1168_s1 + $0x30] sm:$0xff]  ;;  %v268_v50 = vsub.s32 %v265_v43, %v1063_v40  ;;  %v279_v51 = vadd.s32 4294967256, %v246_v39  ;;  %s780_s26 = scalar_lea.vmem %s1119_s17, 2048  ;;  %p1177_p11 = scmp.ne.s32.totalorder %s1174_s24, 0 }
  0x40   : > { %215 = vadd.xlane.f32.xlu1 %v214_v11  ;;  %v681_v33 = vpack.c.bf16 %v234_v32, %v233_v31  ;;  %v236_v35 = vld [vmem:[%s1168_s1 + $0x38] sm:$0xff]  ;;  %v275_v56 = vsub.s32 %v272_v48, %v1063_v40  ;;  %v286_v57 = vadd.s32 4294967248, %v246_v39  ;;  %v293_v61 = vadd.s32 4294967240, %v246_v39  ;;  %v380_v31 = vld [vmem:[%s1169_s2] sm:$0xff]  ;;  %v381_v32 = vld [vmem:[%s1169_s2 + $0x8] sm:$0xff]  ;;  %p781_p6 = scmp.ne.s32.totalorder %s1119_s17, %s780_s26  ;;  %s854_s27 = smov [#allocation5]  }
  0x41   : > { %676 = vmatpush3.bf16.msra.mxu0 %v675_v26  ;;  %v684_v36 = vpack.c.bf16 %v236_v35, %v235_v34  ;;  %v282_v60 = vsub.s32 %v279_v51, %v1063_v40  ;;  %vm300_vm8 = vcmask 523264   ;;  %vm382_vm9 = vcmask 130048   ;;  %s784_s28 = sshll.u32 %s854_s27, 4  ;;  %s785_s28 = int_to_ptr.vmem [resolvable:$false] %s784_s28 }
  0x42   : > { %677 = vmatprep.subr.bf16.mxu0 %v851_v27  ;;  %p782_p12 = pnand %p781_p6, %p1177_p11  ;;  %s786_s29 = scalar_lea.vmem %s785_s28, 4096 }
  0x43   : > { %218 = vadd.xlane.f32.xlu0 %v217_v16  ;;  %v289_v16 = vsub.s32 %v286_v57, %v1063_v40  ;;  %p787_p8 = scmp.lt.s32.totalorder %s1119_s17, %s785_s28  ;;  %p788_p10 = scmp.lt.s32.totalorder %s786_s29, %s780_s26 }
  0x44   : > { %221 = vadd.xlane.f32.xlu1 %v220_v17  ;;  %p783_p13 = pneg %p782_p12 }
  0x45   : > { %679 = vmatpush3.bf16.msra.mxu0 %v678_v30  ;;  %p789_p0 = por %p788_p10, %p787_p8 }
  0x46   : > { %680 = vmatprep.subr.bf16.mxu0 %v851_v27 }
  0x47   : > { %224 = vadd.xlane.f32.xlu0 %v223_v22  ;;  %v296_v22 = vsub.s32 %v293_v61, %v1063_v40  ;;  %p790_p2 = pnand %p789_p0, %p783_p13 }
  0x48   : > { %227 = vadd.xlane.f32.xlu1 %v226_v23 }
  0x49   : > { %682 = vmatpush3.bf16.msra.mxu0 %v681_v33  ;;  %v687_v33 = vpack.c.bf16 %v381_v32, %v380_v31 }
  0x4a   : > { %683 = vmatprep.subr.bf16.mxu0 %v851_v27 }
  0x4b   : > { %688 = vmatpush3.bf16.msra.mxu1 %v687_v33 }
  0x4d   : > { %685 = vmatpush3.bf16.msra.mxu0 %v684_v36 }
  0xc8   : > { %v207_v44 = vpop.xlane.xlu0 %206 }
  0xc9   : > { %v213_v46 = vpop.xlane.xlu1 %212  ;;  %v250_v53 = vrot.slane %v207_v44, %v249_v45 }
  0xca   : > { %v262_v58 = vrot.slane %v213_v46, %v261_v49 }
  0xcc   : > { %v210_v52 = vpop.xlane.xlu0 %209 }
  0xcd   : > { %v255_v54 = vrot.slane %v210_v52, %v254_v47  ;;  %v216_v55 = vpop.xlane.xlu1 %215  ;;  %v464_v47 = vsub.s32 0, %v1063_v40 }
  0xce   : > { %v269_v59 = vrot.slane %v216_v55, %v268_v50 }
  0xcf   : > { %v257_v62 = vsel %vm256_vm1, %v255_v54, %v250_v53 }
  0xd0   : > { %v264_v63 = vsel %vm263_vm2, %v262_v58, %v257_v62  ;;  %v219_v3 = vpop.xlane.xlu0 %218 }
  0xd1   : > { %v271_v7 = vsel %vm270_vm3, %v269_v59, %v264_v63  ;;  %v276_v10 = vrot.slane %v219_v3, %v275_v56  ;;  %v222_v11 = vpop.xlane.xlu1 %221 }
  0xd2   : > { %v283_v17 = vrot.slane %v222_v11, %v282_v60 }
  0xd3   : > { %v278_v23 = vsel %vm277_vm4, %v276_v10, %v271_v7 }
  0xd4   : > { %v225_v24 = vpop.xlane.xlu0 %224  ;;  %v285_v27 = vsel %vm284_vm5, %v283_v17, %v278_v23 }
  0xd5   : > { %v290_v25 = vrot.slane %v225_v24, %v289_v16  ;;  %v228_v26 = vpop.xlane.xlu1 %227 }
  0xd6   : > { %v297_v28 = vrot.slane %v228_v26, %v296_v22 }
  0xd7   : > { %v292_v29 = vsel %vm291_vm6, %v290_v25, %v285_v27 }
  0xd8   : > { %v299_v30 = vsel %vm298_vm7, %v297_v28, %v292_v29 }
  0xd9   : > { %665 = vmatmul.mubr.msk.f32.vlgmr.msra.gmra.mrb[0].mxu0 %vm300_vm8, %v299_v30 }
 0x1ac   : > { %v369_v34 = vpop.f32.mrb[0].mxu0 }
 0x1ad   : > { %v626_v35 = vmul.f32 -1.442695, %v369_v34  ;;  %v666_v36 = vpop.f32.mrb[1].mxu0 }
 0x1af   : > { %742 = vpow2.f32 %v626_v35 }
 0x1b9   : > { %v743_v37 = vpop.eup %742 }
 0x1ba   : > { %v376_v38 = vadd.f32 1.0, %v743_v37 }
 0x1bc   : > { %744 = vrcp.f32 %v376_v38 }
 0x1c6   : > { %v745_v39 = vpop.eup %744 }
 0x1c7   : > { %v379_v41 = vmul.f32 %v745_v39, %v369_v34 }
 0x1c9   : > { %672 = vmatmul.mubr.msk.f32.vlgmr.msra.gmra.mrb[0].mxu1 %vm382_vm9, %v379_v41 }
 0x29c   : > { %v452_v42 = vpop.f32.mrb[0].mxu1 }
 0x29d   : > { %v628_v43 = vmul.f32 -1.442695, %v452_v42  ;;  %v673_v44 = vpop.f32.mrb[1].mxu1 }
 0x29f   : > { %746 = vpow2.f32 %v628_v43 }
 0x2a9   : > { %v747_v45 = vpop.eup %746 }
 0x2aa   : > { %v459_v46 = vadd.f32 1.0, %v747_v45 }
 0x2ac   : > { %748 = vrcp.f32 %v459_v46 }
 0x2b6   : > { %v749_v48 = vpop.eup %748 }
 0x2b7   : > { %v465_v49 = vrot.slane %v749_v48, %v464_v47 }
 0x2b9   : > { %471 = vbcast.lane.b32.xlu1 %v465_v49, 264  ;;  %467 = vbcast.lane.b32.xlu0 %v465_v49, 256 }
 0x2bd   : > { %475 = vbcast.lane.b32.xlu1 %v465_v49, 272  ;;  %483 = vbcast.lane.b32.xlu0 %v465_v49, 288 }
 0x2c1   : > { %479 = vbcast.lane.b32.xlu1 %v465_v49, 280  ;;  %491 = vbcast.lane.b32.xlu0 %v465_v49, 304 }
 0x2c5   : > { %487 = vbcast.lane.b32.xlu1 %v465_v49, 296 }
 0x2c9   : > { %495 = vbcast.lane.b32.xlu1 %v465_v49, 312 }
 0x32b   : > { %v472_v50 = vpop.permute.xlu1 %471  ;;  %v468_v51 = vpop.permute.xlu0 %467 }
 0x32c   : > { %v499_v52 = vmul.f32 %v472_v50, %v1001_v5  ;;  %v500_v53 = vmul.f32 %v472_v50, %v1003_v6  ;;  %v497_v54 = vmul.f32 %v468_v51, %v991_v0  ;;  %v498_v40 = vmul.f32 %v468_v51, %v993_v1 }
 0x32e   : > { %515 = vst [vmem:[%s1086_s8 + $0x10] sm:$0xff] %v499_v52  ;;  %516 = vst [vmem:[%s1086_s8 + $0x18] sm:$0xff] %v500_v53 }
 0x32f   : > { %513 = vst [vmem:[%s1086_s8] sm:$0xff] %v497_v54  ;;  %514 = vst [vmem:[%s1086_s8 + $0x8] sm:$0xff] %v498_v40  ;;  %v476_v5 = vpop.permute.xlu1 %475  ;;  %v484_v0 = vpop.permute.xlu0 %483 }
 0x330   : > { %v501_v1 = vmul.f32 %v476_v5, %v995_v2  ;;  %v502_v6 = vmul.f32 %v476_v5, %v999_v4  ;;  %v505_v55 = vmul.f32 %v484_v0, %v1015_v12  ;;  %v506_v56 = vmul.f32 %v484_v0, %v1017_v13 }
 0x332   : > { %517 = vst [vmem:[%s1086_s8 + $0x20] sm:$0xff] %v501_v1  ;;  %518 = vst [vmem:[%s1086_s8 + $0x28] sm:$0xff] %v502_v6 }
 0x333   : > { %521 = vst [vmem:[%s1086_s8 + $0x40] sm:$0xff] %v505_v55  ;;  %522 = vst [vmem:[%s1086_s8 + $0x48] sm:$0xff] %v506_v56  ;;  %v480_v57 = vpop.permute.xlu1 %479  ;;  %v492_v58 = vpop.permute.xlu0 %491 }
 0x334   : > { %v503_v2 = vmul.f32 %v480_v57, %v1007_v8  ;;  %v504_v59 = vmul.f32 %v480_v57, %v1009_v9  ;;  %v509_v4 = vmul.f32 %v492_v58, %v1027_v18  ;;  %v510_v12 = vmul.f32 %v492_v58, %v1029_v19 }
 0x336   : > { %519 = vst [vmem:[%s1086_s8 + $0x30] sm:$0xff] %v503_v2  ;;  %520 = vst [vmem:[%s1086_s8 + $0x38] sm:$0xff] %v504_v59 }
 0x337   : > { %525 = vst [vmem:[%s1086_s8 + $0x60] sm:$0xff] %v509_v4  ;;  %526 = vst [vmem:[%s1086_s8 + $0x68] sm:$0xff] %v510_v12  ;;  %v488_v13 = vpop.permute.xlu1 %487 }
 0x338   : > { %v507_v60 = vmul.f32 %v488_v13, %v1019_v14  ;;  %v508_v61 = vmul.f32 %v488_v13, %v1021_v15 }
 0x33a   : > { %523 = vst [vmem:[%s1086_s8 + $0x50] sm:$0xff] %v507_v60  ;;  %524 = vst [vmem:[%s1086_s8 + $0x58] sm:$0xff] %v508_v61 }
 0x33b   : > { %v496_v8 = vpop.permute.xlu1 %495 }
 0x33c   : > { %v511_v9 = vmul.f32 %v496_v8, %v1031_v20  ;;  %v512_v14 = vmul.f32 %v496_v8, %v1033_v21 }
 0x33e   : > { %527 = vst [vmem:[%s1086_s8 + $0x70] sm:$0xff] %v511_v9  ;;  %528 = vst [vmem:[%s1086_s8 + $0x78] sm:$0xff] %v512_v14 }
 0x33f   : > { %793 = shalt.err (!%p790_p2)
}
 0x340   : > { %s794_s30 = scalar_lea.hbm %s1117_s22, 2048  ;;  %s798_s23 = scalar_lea.hbm %s1170_s3, 4096 }
 0x341   : > { %p795_p4 = scmp.ne.s32.totalorder %s1117_s22, %s794_s30  ;;  %p799_p9 = scmp.lt.u32.totalorder %s1117_s22, %s1170_s3 }
 0x342   : > { %p800_p1 = scmp.lt.u32.totalorder %s798_s23, %s794_s30  ;;  %p802_p6 = scmp.lt.u32.totalorder %s794_s30, %s1117_s22 }
 0x343   : > { %p796_p5 = pnand %p795_p4, %p1177_p11 }
 0x344   : > { %p801_p3 = por %p800_p1, %p799_p9 }
 0x345   : > { %p797_p7 = pneg %p796_p5 }
 0x346   : > { %p803_p12 = por %p802_p6, %p801_p3 }
 0x348   : > { %p804_p13 = pnand %p803_p12, %p797_p7 }
 0x34a   : > { %807 = shalt.err (!%p804_p13)
}
 0x34b   : > { %s855_s7 = smov 256   ;;  %s856_s8 = smov 16  }
 0x34c   : > { %691 = dma.vmem_to_hbm [thread:$0]  (%p1177_p11), %s1119_s17, 2048, %s1117_s22, %s530_s16, %s855_s7, %s855_s7, %s856_s8  }
 0x34d PF: > { %s558_s9 = sand.u32 1, %s834_s12   ;;  %p1178_p8 = scmp.ne.s32.totalorder %s1175_s25, 0 }
 0x34e   : > { %p1179_p10 = scmp.ge.s32.totalorder %s846_s15, 2  ;;  %s559_s19 = scalar_lea.sflag [#allocation4], %s558_s9 }
 0x350   : > { %p698_p0 = pnand %p1179_p10, %p1178_p8 }
 0x352   : > { %829 = dma.done.wait (!%p698_p0), %s559_s19, 2048  }
 0x353   : > { %831 = vsyncadd (!%p698_p0), %s559_s19, 4294965248  ;;  %p16_p2 = scmp.ge.s32.totalorder %s902_s18, 4   ;;  %s1180_s12 = smov %s838_s13 }
 0x354   : > { %s1181_s13 = smov %s842_s14  ;;  %s1182_s14 = smov %s914_s21 }
 0x355   : > { %s1183_s15 = smov %s902_s18  ;;  %18 = sbr.rel (!%p16_p2) target bundleno = 5 (0x5), region = 77 }
 0x35c   :  { %564 = vsyncpa [#allocation3], 1 }
 0x35d   :  { %566 = vsyncpa [#allocation3 + $0x1], 1 }
 0x35e   :  { %567 = vsyncpa [#allocation4], 1 }
 0x35f   :  { %569 = vsyncpa [#allocation4 + $0x1], 1 }

</bundles_post_ra>
